<compile_context>
chip_gen: v7x
topology: tpu7x:2x2x1
jax: 0.10.0
libtpu: 0.0.40
codegen_flags: <defaults>
</compile_context>

<pallas_src>
import functools

import jax
import jax.numpy as jnp
import numpy as np
from jax.experimental import pallas as pl
from jax.experimental.pallas import tpu as pltpu

GAMMA = 2                 # focusing parameter (module default)
_LANES = 128
_SUBLANES = 8
_MAX_BLOCK_ROWS = 1024    # 1024*128*4 B = 512 KiB per input block


def _round_up(x, m):
    return ((x + m - 1) // m) * m


def _binary_focal_loss_kernel(x_ref, t_ref, psum_ref, *, total_n, block_rows, needs_mask):
    """(block_rows, 128) logits/targets -> (8, 128) per-block partial loss sums."""
    x = x_ref[...].astype(jnp.float32)
    t = t_ref[...].astype(jnp.float32)

    # One EUP exp per element, reused for sigmoid AND the stable BCE log term.
    e = jnp.exp(-jnp.abs(x))
    r = 1.0 / (1.0 + e)  # exact (pl.reciprocal(..., approx=True) would trade ~1e-4 accuracy)
    probs = jnp.where(x >= 0.0, r, e * r)                 # sigmoid(x)
    bce = jnp.maximum(x, 0.0) - x * t + jnp.log1p(e)      # BCE-with-logits, reduction='none'

    p_t = probs * t + (1.0 - probs) * (1.0 - t)
    w = 1.0 - p_t
    loss = (w * w) * bce                                  # gamma = 2 -> explicit multiply
    # alpha is None in the default config: no class-balancing term.

    if needs_mask:  # static Python flag; only emitted when padding exists
        i = pl.program_id(0)
        row = i * block_rows + jax.lax.broadcasted_iota(jnp.int32, (block_rows, _LANES), 0)
        lane = jax.lax.broadcasted_iota(jnp.int32, (block_rows, _LANES), 1)
        loss = jnp.where(row * _LANES + lane < total_n, loss, 0.0)

    # Collapse the row axis with pure VPU (vreg-wise) adds; the one expensive
    # cross-lane/cross-sublane reduce happens once, outside the kernel.
    psum_ref[...] = loss.reshape(block_rows // _SUBLANES, _SUBLANES, _LANES).sum(axis=0)


def binary_focal_loss(logits, targets):
    """Mean binary focal loss (gamma=2, alpha=None) computed with a Pallas TPU kernel."""
    assert logits.shape == targets.shape
    n = logits.size

    rows = pl.cdiv(n, _LANES)
    block_rows = min(_MAX_BLOCK_ROWS, _round_up(rows, _SUBLANES))
    total_rows = _round_up(rows, block_rows)
    num_blocks = total_rows // block_rows
    padded = total_rows * _LANES

    # Keep native dtypes (kernel casts in VMEM); pad only if the batch is ragged.
    x = logits.reshape(-1)
    t = targets.reshape(-1)
    if padded != n:
        x = jnp.pad(x, (0, padded - n))
        t = jnp.pad(t, (0, padded - n))
    x2d = x.reshape(total_rows, _LANES)
    t2d = t.reshape(total_rows, _LANES)

    kernel = functools.partial(
        _binary_focal_loss_kernel,
        total_n=n, block_rows=block_rows, needs_mask=(padded != n))

    partial_sums = pl.pallas_call(
        kernel,
        out_shape=jax.ShapeDtypeStruct((num_blocks * _SUBLANES, _LANES), jnp.float32),
        grid_spec=pltpu.PrefetchScalarGridSpec(
            num_scalar_prefetch=0,
            grid=(num_blocks,),
            in_specs=[
                pl.BlockSpec((block_rows, _LANES), lambda i: (i, 0)),
                pl.BlockSpec((block_rows, _LANES), lambda i: (i, 0)),
            ],
            out_specs=pl.BlockSpec((_SUBLANES, _LANES), lambda i: (i, 0)),
        ),
        compiler_params=pltpu.CompilerParams(
            # Each step writes its own partial-sum block -> no cross-step state,
            # so the axis is genuinely parallel (both TCs on v7x).
            dimension_semantics=("parallel",),
        ),
    )(x2d, t2d)

    # Tiny epilogue: single reduce + multiply by precomputed 1/n (no divide).
    return jnp.sum(partial_sums) * jnp.float32(1.0 / n)


def _focal_loss_ref(logits, targets):
    """Pure-JAX reference mirroring the PyTorch binary_focal_loss branch."""
    x = logits.astype(jnp.float32)
    t = targets.astype(jnp.float32)
    probs = jax.nn.sigmoid(x)
    bce = jnp.maximum(x, 0.0) - x * t + jnp.log1p(jnp.exp(-jnp.abs(x)))
    p_t = probs * t + (1.0 - probs) * (1.0 - t)
    loss = (1.0 - p_t) ** GAMMA * bce
    return jnp.mean(loss)


if __name__ == "__main__":
    key = jax.random.PRNGKey(0)
    k_logit, k_tgt = jax.random.split(key)

    # Ragged batch (not a multiple of 8*128) to exercise the masked tail path.
    batch = 2000
    logits = jax.random.normal(k_logit, (batch,), dtype=jnp.float32) * 2.0
    targets = jax.random.bernoulli(k_tgt, p=0.5, shape=(batch,)).astype(jnp.float32)

    loss = jax.block_until_ready(binary_focal_loss(logits, targets))
    ref = jax.block_until_ready(_focal_loss_ref(logits, targets))

    np.testing.assert_allclose(np.asarray(loss), np.asarray(ref), rtol=1e-5, atol=1e-6)
    print("KERNEL_OK")
</pallas_src>

<mosaic_0001>
module attributes {stable_mosaic.version = 11 : i64} {
  func.func @_binary_focal_loss_kernel(%arg0: i32, %arg1: memref<16x128xf32, #tpu.memory_space<vmem>>, %arg2: memref<16x128xf32, #tpu.memory_space<vmem>>, %arg3: memref<8x128xf32, #tpu.memory_space<vmem>>) attributes {dimension_semantics = [#tpu.dimension_semantics<parallel>], iteration_bounds = array<i64: 1>, scalar_prefetch = 0 : i64, scratch_operands = 0 : i64, tpu.core_type = #tpu.core_type<tc>, window_params = [{transform_indices = @transform_0, window_bounds = array<i64: 16, 128>}, {transform_indices = @transform_1, window_bounds = array<i64: 16, 128>}, {transform_indices = @transform_2, window_bounds = array<i64: 8, 128>}]} {
    %c0 = arith.constant 0 : index
    %c0_0 = arith.constant 0 : index
    %0 = vector.load %arg1[%c0, %c0_0] : memref<16x128xf32, #tpu.memory_space<vmem>>, vector<16x128xf32>
    %c0_1 = arith.constant 0 : index
    %c0_2 = arith.constant 0 : index
    %1 = vector.load %arg2[%c0_1, %c0_2] : memref<16x128xf32, #tpu.memory_space<vmem>>, vector<16x128xf32>
    %2 = math.absf %0 : vector<16x128xf32>
    %cst = arith.constant 0.000000e+00 : f32
    %3 = vector.broadcast %cst : f32 to vector<16x128xf32>
    %4 = arith.subf %3, %2 : vector<16x128xf32>
    %5 = math.exp %4 : vector<16x128xf32>
    %cst_3 = arith.constant 1.000000e+00 : f32
    %6 = vector.broadcast %cst_3 : f32 to vector<16x128xf32>
    %7 = arith.addf %6, %5 : vector<16x128xf32>
    %cst_4 = arith.constant 1.000000e+00 : f32
    %8 = vector.broadcast %cst_4 : f32 to vector<16x128xf32>
    %9 = arith.divf %8, %7 : vector<16x128xf32>
    %cst_5 = arith.constant 0.000000e+00 : f32
    %10 = vector.broadcast %cst_5 : f32 to vector<16x128xf32>
    %11 = arith.cmpf oge, %0, %10 : vector<16x128xf32>
    %12 = arith.mulf %5, %9 : vector<16x128xf32>
    %13 = arith.select %11, %9, %12 : vector<16x128xi1>, vector<16x128xf32>
    %cst_6 = arith.constant 0.000000e+00 : f32
    %14 = vector.broadcast %cst_6 : f32 to vector<16x128xf32>
    %15 = arith.maximumf %0, %14 : vector<16x128xf32>
    %16 = arith.mulf %0, %1 : vector<16x128xf32>
    %17 = arith.subf %15, %16 : vector<16x128xf32>
    %18 = math.log1p %5 : vector<16x128xf32>
    %19 = arith.addf %17, %18 : vector<16x128xf32>
    %20 = arith.mulf %13, %1 : vector<16x128xf32>
    %cst_7 = arith.constant 1.000000e+00 : f32
    %21 = vector.broadcast %cst_7 : f32 to vector<16x128xf32>
    %22 = arith.subf %21, %13 : vector<16x128xf32>
    %cst_8 = arith.constant 1.000000e+00 : f32
    %23 = vector.broadcast %cst_8 : f32 to vector<16x128xf32>
    %24 = arith.subf %23, %1 : vector<16x128xf32>
    %25 = arith.mulf %22, %24 : vector<16x128xf32>
    %26 = arith.addf %20, %25 : vector<16x128xf32>
    %cst_9 = arith.constant 1.000000e+00 : f32
    %27 = vector.broadcast %cst_9 : f32 to vector<16x128xf32>
    %28 = arith.subf %27, %26 : vector<16x128xf32>
    %29 = arith.mulf %28, %28 : vector<16x128xf32>
    %30 = arith.mulf %29, %19 : vector<16x128xf32>
    %c16_i32 = arith.constant 16 : i32
    %31 = arith.muli %arg0, %c16_i32 : i32
    %32 = tpu.iota {dimensions = array<i32: 0>} : vector<16x128xi32>
    %33 = vector.broadcast %31 : i32 to vector<16x128xi32>
    %34 = arith.addi %33, %32 : vector<16x128xi32>
    %35 = tpu.iota {dimensions = array<i32: 1>} : vector<16x128xi32>
    %c128_i32 = arith.constant 128 : i32
    %36 = vector.broadcast %c128_i32 : i32 to vector<16x128xi32>
    %37 = arith.muli %34, %36 : vector<16x128xi32>
    %38 = arith.addi %37, %35 : vector<16x128xi32>
    %c2000_i32 = arith.constant 2000 : i32
    %39 = vector.broadcast %c2000_i32 : i32 to vector<16x128xi32>
    %40 = arith.cmpi slt, %38, %39 : vector<16x128xi32>
    %cst_10 = arith.constant 0.000000e+00 : f32
    %41 = vector.broadcast %cst_10 : f32 to vector<16x128xf32>
    %42 = arith.select %40, %30, %41 : vector<16x128xi1>, vector<16x128xf32>
    %43 = vector.shape_cast %42 : vector<16x128xf32> to vector<2x8x128xf32>
    %cst_11 = arith.constant dense<0.000000e+00> : vector<8x128xf32>
    %44 = vector.multi_reduction <add>, %43, %cst_11 [0] : vector<2x8x128xf32> to vector<8x128xf32>
    %c0_12 = arith.constant 0 : index
    %c0_13 = arith.constant 0 : index
    %45 = vector.load %arg3[%c0_12, %c0_13] : memref<8x128xf32, #tpu.memory_space<vmem>>, vector<8x128xf32>
    tpu.vector_store %arg3[%c0_12, %c0_13], %44 {strides = array<i32>} : memref<8x128xf32, #tpu.memory_space<vmem>>, vector<8x128xf32>,
    return
  }
  func.func @transform_0(%arg0: i32) -> (i32, i32) {
    %c0_i32 = arith.constant 0 : i32
    %c0_i32_0 = arith.constant 0 : i32
    return %arg0, %c0_i32 : i32, i32
  }
  func.func @transform_1(%arg0: i32) -> (i32, i32) {
    %c0_i32 = arith.constant 0 : i32
    %c0_i32_0 = arith.constant 0 : i32
    return %arg0, %c0_i32 : i32, i32
  }
  func.func @transform_2(%arg0: i32) -> (i32, i32) {
    %c0_i32 = arith.constant 0 : i32
    %c0_i32_0 = arith.constant 0 : i32
    return %arg0, %c0_i32 : i32, i32
  }
}

</mosaic_0001>

<bundles_post_ra>
// kernel: tpu_custom_call.1
= control target key start
LH: loop header
LB: loop body
LE: loop exit
PB: predicated region body
PF: predicated region fallthrough
CT: control target
= control target key end

     0   :  { %7 = vsyncpa [#allocation3], 0  ;;  %s299_s0 = inlined_call_operand.hbm [shape: f32[16,128], index: 0, kind: input, shape index: {}]   ;;  %s300_s1 = inlined_call_operand.hbm [shape: f32[16,128], index: 1, kind: input, shape index: {}]   ;;  %s301_s2 = inlined_call_operand.hbm [shape: f32[8,128], index: 2, kind: output, shape index: {}]  }
   0x1   :  { %8 = vsyncpa [#allocation6], 0 }
   0x2   :  { %9 = vsyncpa [#allocation4], 0  ;;  %s230_s9 = smov [#allocation2]   ;;  %s158_s13 = scalar_lea.hbm %s299_s0, 256 }
   0x3   :  { %s15_s10 = sshll.u32 %s230_s9, 4  ;;  %p159_p0 = scmp.ne.s32.totalorder %s299_s0, %s158_s13  ;;  %s16_s10 = int_to_ptr.vmem [resolvable:$true] %s15_s10 }
   0x4   :  { %p162_p1 = scmp.lt.u32.totalorder %s158_s13, %s299_s0 }
   0x6   :  { %p164_p2 = pnand %p162_p1, %p159_p0 }
   0x8   :  { %167 = shalt.err (!%p164_p2)
}
   0x9   :  { %s168_s18 = scalar_lea.vmem %s16_s10, 256  ;;  %p173_p4 = scmp.lt.s32.totalorder %s16_s10, %s16_s10 }
   0xa   :  { %p169_p3 = scmp.ne.s32.totalorder %s16_s10, %s168_s18  ;;  %p174_p5 = scmp.lt.s32.totalorder %s168_s18, %s168_s18 }
   0xc   :  { %p175_p6 = por %p174_p5, %p173_p4 }
   0xe   :  { %p176_p7 = pnand %p175_p6, %p169_p3 }
  0x10   :  { %179 = shalt.err (!%p176_p7)
}
  0x11   :  { %s231_s19 = smov 128   ;;  %s232_s20 = smov 8  }
  0x12   :  { %21 = dma.hbm_to_vmem [thread:$0]  %s299_s0, 256, %s16_s10, [#allocation3], %s231_s19, %s231_s19, %s232_s20  }
  0x13   :  { %s233_s23 = smov [#allocation5]   ;;  %s180_s27 = scalar_lea.hbm %s300_s1, 256 }
  0x14   :  { %s27_s24 = sshll.u32 %s233_s23, 4  ;;  %p181_p8 = scmp.ne.s32.totalorder %s300_s1, %s180_s27  ;;  %s28_s24 = int_to_ptr.vmem [resolvable:$true] %s27_s24 }
  0x15   :  { %p184_p9 = scmp.lt.u32.totalorder %s180_s27, %s300_s1 }
  0x17   :  { %p186_p10 = pnand %p184_p9, %p181_p8 }
  0x19   :  { %189 = shalt.err (!%p186_p10)
}
  0x1a   :  { %s190_s4 = scalar_lea.vmem %s28_s24, 256  ;;  %p195_p12 = scmp.lt.s32.totalorder %s28_s24, %s28_s24 }
  0x1b   :  { %p191_p11 = scmp.ne.s32.totalorder %s28_s24, %s190_s4  ;;  %p196_p13 = scmp.lt.s32.totalorder %s190_s4, %s190_s4 }
  0x1d   :  { %p197_p0 = por %p196_p13, %p195_p12 }
  0x1f   :  { %p198_p1 = pnand %p197_p0, %p191_p11 }
  0x21   :  { %201 = shalt.err (!%p198_p1)
}
  0x22   :  { %33 = dma.hbm_to_vmem [thread:$0]  %s300_s1, 256, %s28_s24, [#allocation6], %s231_s19, %s231_s19, %s232_s20  }
  0x23   :  { %224 = dma.done.wait [#allocation3], 256  }
  0x24   :  { %225 = vsyncadd [#allocation3], 4294967040 }
  0x25   :  { %226 = dma.done.wait [#allocation6], 256  }
  0x26   :  { %227 = vsyncadd [#allocation6], 4294967040  ;;  %v40_v0 = vld [vmem:[#allocation2] sm:$0xff]  ;;  %v41_v1 = vld [vmem:[#allocation2 + $0x8] sm:$0xff]  ;;  %v107_v12 = vlaneseq  ;;  %s234_s1 = smov [#allocation7]  }
  0x27   :  { %v44_v2 = vand.u32 2147483647, %v40_v0  ;;  %v45_v3 = vand.u32 2147483647, %v41_v1  ;;  %v42_v17 = vld [vmem:[#allocation5] sm:$0xff]  ;;  %v43_v18 = vld [vmem:[#allocation5 + $0x8] sm:$0xff] }
  0x28   :  { %v108_v15 = vshrl.u32 %v107_v12, 7  ;;  %v114_v22 = vand.u32 127, %v107_v12  ;;  %vm58_vm0 = vcmp.ge.f32.partialorder %v40_v0, 0.0  ;;  %vm59_vm1 = vcmp.ge.f32.partialorder %v41_v1, 0.0  ;;  %s131_s6 = sshll.u32 %s234_s1, 4  ;;  %s132_s6 = int_to_ptr.vmem [resolvable:$true] %s131_s6 }
  0x29   :  { %v46_v4 = vsub.f32 0.0, %v44_v2  ;;  %v47_v5 = vsub.f32 0.0, %v45_v3  ;;  %v64_v24 = vmax.f32 %v40_v0, 0.0  ;;  %v66_v25 = vmul.f32 %v42_v17, %v40_v0  ;;  %s202_s7 = scalar_lea.vmem %s132_s6, 128  ;;  %p207_p3 = scmp.lt.s32.totalorder %s132_s6, %s132_s6 }
  0x2a   :  { %v109_v21 = vadd.s32 8, %v108_v15  ;;  %v65_v28 = vmax.f32 %v41_v1, 0.0  ;;  %v67_v29 = vmul.f32 %v43_v18, %v41_v1  ;;  %v94_v34 = vsub.f32 1.0, %v42_v17  ;;  %p203_p2 = scmp.ne.s32.totalorder %s132_s6, %s202_s7  ;;  %p208_p4 = scmp.lt.s32.totalorder %s202_s7, %s202_s7 }
  0x2b   :  { %v48_v6 = vmul.f32 1.442695, %v46_v4  ;;  %v50_v7 = vmul.f32 1.442695, %v47_v5  ;;  %v95_v35 = vsub.f32 1.0, %v43_v18  ;;  %v115_v48 = vmul.u32 128, %v108_v15 }
  0x2c   :  { %v68_v49 = vsub.f32 %v64_v24, %v66_v25  ;;  %v116_v51 = vmul.u32 128, %v109_v21  ;;  %v69_v52 = vsub.f32 %v65_v28, %v67_v29  ;;  %p209_p5 = por %p208_p4, %p207_p3 }
  0x2d   :  { %146 = vpow2.f32 %v48_v6  ;;  %v117_v58 = vadd.s32 %v115_v48, %v114_v22 }
  0x2e   :  { %148 = vpow2.f32 %v50_v7  ;;  %v118_v61 = vadd.s32 %v116_v51, %v114_v22  ;;  %p210_p6 = pnand %p209_p5, %p203_p2 }
  0x2f   :  { %vm119_vm4 = vcmp.lt.s32.totalorder %v117_v58, 2000 }
  0x30   :  { %vm120_vm5 = vcmp.lt.s32.totalorder %v118_v61, 2000 }
  0x37   :  { %v147_v8 = vpop.eup %146 }
  0x38   :  { %v149_v9 = vpop.eup %148  ;;  %v52_v10 = vadd.f32 1.0, %v147_v8  ;;  %v73_v13 = vmul.f32 -0.5, %v147_v8  ;;  %v76_v16 = vand.u32 2147483647, %v147_v8 }
  0x39   :  { %v53_v11 = vadd.f32 1.0, %v149_v9  ;;  %v82_v14 = vmul.f32 -0.5, %v149_v9  ;;  %v85_v30 = vand.u32 2147483647, %v149_v9 }
  0x3a   :  { %150 = vrcp.f32 %v52_v10  ;;  %v74_v19 = vadd.f32 1.0, %v73_v13  ;;  %vm274_vm2 = vcmp.lt.f32.partialorder %v76_v16, 0.0004427343 }
  0x3b   :  { %152 = vrcp.f32 %v53_v11  ;;  %v83_v20 = vadd.f32 1.0, %v82_v14  ;;  %vm279_vm3 = vcmp.lt.f32.partialorder %v85_v30, 0.0004427343 }
  0x3c   :  { %154 = vlog2.f32 %v52_v10  ;;  %v75_v39 = vmul.f32 %v147_v8, %v74_v19 }
  0x3d   :  { %156 = vlog2.f32 %v53_v11  ;;  %v84_v40 = vmul.f32 %v149_v9, %v83_v20 }
  0x44   :  { %v151_v23 = vpop.eup %150 }
  0x45   :  { %v153_v26 = vpop.eup %152  ;;  %v60_v27 = vmul.f32 %v151_v23, %v147_v8 }
  0x46   :  { %v155_v31 = vpop.eup %154  ;;  %v61_v32 = vmul.f32 %v153_v26, %v149_v9 }
  0x47   :  { %v157_v36 = vpop.eup %156  ;;  %v62_v37 = vsel %vm58_vm0, %v151_v23, %v60_v27  ;;  %v72_v38 = vmul.f32 0.6931472, %v155_v31 }
  0x48   :  { %v63_v41 = vsel %vm59_vm1, %v153_v26, %v61_v32  ;;  %v81_v42 = vmul.f32 0.6931472, %v157_v36  ;;  %v90_v43 = vmul.f32 %v62_v37, %v42_v17  ;;  %v92_v44 = vsub.f32 1.0, %v62_v37 }
  0x49   :  { %v91_v46 = vmul.f32 %v63_v41, %v43_v18  ;;  %v93_v47 = vsub.f32 1.0, %v63_v41  ;;  %v78_v53 = vsel %vm274_vm2, %v75_v39, %v72_v38 }
  0x4a   :  { %v96_v50 = vmul.f32 %v94_v34, %v92_v44  ;;  %v87_v55 = vsel %vm279_vm3, %v84_v40, %v81_v42  ;;  %v88_v59 = vadd.f32 %v78_v53, %v68_v49 }
  0x4b   :  { %v97_v54 = vmul.f32 %v95_v35, %v93_v47  ;;  %v89_v62 = vadd.f32 %v87_v55, %v69_v52 }
  0x4c   :  { %v98_v56 = vadd.f32 %v96_v50, %v90_v43 }
  0x4d   :  { %v99_v57 = vadd.f32 %v97_v54, %v91_v46 }
  0x4e   :  { %v100_v60 = vsub.f32 1.0, %v98_v56 }
  0x4f   :  { %v101_v63 = vsub.f32 1.0, %v99_v57 }
  0x50   :  { %v102_v0 = vmul.f32 %v100_v60, %v100_v60 }
  0x51   :  { %v103_v1 = vmul.f32 %v101_v63, %v101_v63 }
  0x52   :  { %v104_v2 = vmul.f32 %v102_v0, %v88_v59 }
  0x53   :  { %v105_v3 = vmul.f32 %v103_v1, %v89_v62 }
  0x54   :  { %v121_v4 = vsel %vm119_vm4, %v104_v2, 0.0 }
  0x55   :  { %v122_v5 = vsel %vm120_vm5, %v105_v3, 0.0 }
  0x56   :  { %v123_v6 = vadd.f32 %v122_v5, %v121_v4 }
  0x58   :  { %124 = vst [vmem:[#allocation7] sm:$0xff] %v123_v6 }
  0x59   :  { %213 = shalt.err (!%p210_p6)
}
  0x5a   :  { %s214_s10 = scalar_lea.hbm %s301_s2, 128 }
  0x5b   :  { %p215_p7 = scmp.ne.s32.totalorder %s301_s2, %s214_s10  ;;  %p218_p8 = scmp.lt.u32.totalorder %s214_s10, %s301_s2 }
  0x5d   :  { %p220_p9 = pnand %p218_p8, %p215_p7 }
  0x5f   :  { %223 = shalt.err (!%p220_p9)
}
  0x60   :  { %134 = dma.vmem_to_hbm [thread:$0]  %s132_s6, 128, %s301_s2, [#allocation4]  }
  0x61   :  { %228 = dma.done.wait [#allocation4], 128  }
  0x62   :  { %229 = vsyncadd [#allocation4], 4294967168 }
  0x63   :  { %138 = vsyncpa [#allocation3], 1 }
  0x64   :  { %139 = vsyncpa [#allocation6], 1 }
  0x65   :  { %140 = vsyncpa [#allocation4], 1 }

</bundles_post_ra>
